<compile_context>
chip_gen: v7x
topology: tpu7x:2x2x1
jax: 0.10.0
libtpu: 0.0.40
codegen_flags: <defaults>
</compile_context>

<pallas_src>
import functools

import jax
import jax.numpy as jnp
from jax import lax
from jax.experimental import pallas as pl
from jax.experimental.pallas import tpu as pltpu

NUM_LAYERS = 6
BN_EPS = 1e-5
LANE = 128


def _round_up(v, m):
    return (v + m - 1) // m * m


def _vmem_cap_bytes():
    """Per-generation cap for the declared VMEM limit (~5/8 of physical)."""
    cap = 64 * 1024 * 1024  # conservative (v7x-sized) fallback
    try:
        info = pltpu.get_tpu_info()
        cap = int(getattr(info, "vmem_capacity_bytes", cap))
    except Exception:
        pass
    return (cap * 5) // 8


_VMEM_CAP = _vmem_cap_bytes()


def _identity_mapping_kernel(x_ref, w_ref, gb_ref, o_ref, *, inv_n):
    """6 x (center-tap conv matmul + training-mode BN), residual add at end.

    Shapes (Cp = channels zero-padded to a multiple of 128 lanes):
      x_ref:  (N, Cp)        input activations
      w_ref:  (L, Cp, Cp)    center conv taps, pre-transposed to (in, out)
      gb_ref: (L, 2, Cp)     row 0 = BN gamma, row 1 = BN beta
      o_ref:  (N, Cp)        output = last layer + input (residual add)

    Padded channels provably stay exactly 0 through every layer (zero weight
    column => y=0, mean=0, var=0, gamma=0 => s=0, beta=0 => h=0), so the real
    channels are unaffected by padding.

    NOTE: the conv == center-tap-matmul reduction is ONLY valid because the
    spatial extent is 1x1 with padding 1; do not reuse for H, W > 1.

    The conv bias is intentionally omitted: a per-channel constant added
    before a training-mode BatchNorm cancels exactly (mean subtraction and
    variance are shift invariant), so it is unobservable in the output.
    """
    h = x_ref[...].astype(jnp.float32)

    for layer in range(NUM_LAYERS):  # static unroll: full LLO visibility
        w = w_ref[layer]          # (Cp, Cp), (in, out) layout
        gb = gb_ref[layer]        # (2, Cp)
        gamma = gb[0:1, :]        # (1, Cp)
        beta = gb[1:2, :]         # (1, Cp)

        # Conv2d(k=3, p=1) on a 1x1 spatial map == matmul with the center tap.
        y = jnp.dot(h, w, preferred_element_type=jnp.float32)

        # BatchNorm2d, training mode: biased batch statistics over N (H=W=1).
        # Centered two-pass variance (matches PyTorch numerics, no E[y^2]
        # cancellation); the centered activations are reused for the affine.
        mean = jnp.sum(y, axis=0, keepdims=True) * inv_n
        yc = y - mean
        var = jnp.sum(yc * yc, axis=0, keepdims=True) * inv_n

        # Folded affine: one mul + one add per element (rsqrt -> EUP slot).
        s = gamma * lax.rsqrt(var + BN_EPS)
        h = yc * s + beta

    # Residual add: re-read the input here instead of keeping a live f32
    # copy across all six layers.  Lane-dense (Cp multiple of 128) output
    # => unmasked vst stores.
    o_ref[...] = (h + x_ref[...].astype(jnp.float32)).astype(o_ref.dtype)


@jax.jit
def identity_mapping_forward(x, w_padded, gb_padded):
    """x: (N, C) float32; params already lane-dense from init_params().

    Returns (N, C, 1, 1) to match the PyTorch module.
    """
    n, c = x.shape
    cp = w_padded.shape[-1]
    pad_c = cp - c

    # Only the (small, per-call) activation needs padding; parameters were
    # padded once at init.  Padded channels stay exactly zero in the kernel.
    x_p = jnp.pad(x, ((0, 0), (0, pad_c))) if pad_c else x

    # VMEM budget: activations (~6 live N*Cp f32 slabs: x, out, h, y, yc, ...)
    # plus parameters, +25% headroom, + fixed pad for Mosaic-internal scratch.
    # Error (rather than silently clamping) if the whole-batch design no
    # longer fits; see TODO(synk) at the top for the batch-tiled fallback.
    est = 4 * (6 * n * cp) + 4 * (w_padded.size + gb_padded.size)
    need = int(est * 1.25) + (4 << 20)
    if need > _VMEM_CAP:
        raise ValueError(
            f"Batch too large for whole-batch-in-VMEM kernel "
            f"(need ~{need} B, cap {_VMEM_CAP} B); batch-tiled two-phase-BN "
            f"path not implemented yet."
        )
    vmem_limit = need

    kernel = functools.partial(_identity_mapping_kernel, inv_n=1.0 / n)
    out2d = pl.pallas_call(
        kernel,
        out_shape=jax.ShapeDtypeStruct((n, cp), x.dtype),
        in_specs=[pl.BlockSpec(memory_space=pltpu.MemorySpace.VMEM)] * 3,
        out_specs=pl.BlockSpec(memory_space=pltpu.MemorySpace.VMEM),
        compiler_params=pltpu.CompilerParams(vmem_limit_bytes=vmem_limit),
    )(x_p, w_padded, gb_padded)

    return out2d[:, :c].reshape(n, c, 1, 1)


def init_params(hidden_channels):
    """Params mirroring ZeroConvBatchNorm.__init__, pre-padded to Cp lanes.

    Returns:
      w_center: (L, Cp, Cp) f32  center conv taps, (in, out) layout, zero-init.
      gb:       (L, 2, Cp)  f32  row 0 = gamma (1 on real channels, 0 on pad),
                                 row 1 = beta (0).
    The conv bias is omitted on purpose (it cancels under training-mode BN).
    """
    c = hidden_channels
    cp = _round_up(c, LANE)
    w_center = jnp.zeros((NUM_LAYERS, cp, cp), jnp.float32)
    gamma = jnp.zeros((NUM_LAYERS, cp), jnp.float32).at[:, :c].set(1.0)
    beta = jnp.zeros((NUM_LAYERS, cp), jnp.float32)
    gb = jnp.stack([gamma, beta], axis=1)  # (L, 2, Cp)
    return w_center, gb


if __name__ == "__main__":
    batch = 8
    hidden_channels = 32

    key = jax.random.PRNGKey(0)
    k_x, k_w = jax.random.split(key)
    x = jax.random.normal(k_x, (batch, hidden_channels), jnp.float32)

    # --- Test 1: module exactly at init (zero conv weights, default BN). ---
    # Zero conv weights + training-mode BN => exact identity mapping.
    w_pad, gb_pad = init_params(hidden_channels)
    out = jax.block_until_ready(identity_mapping_forward(x, w_pad, gb_pad))
    assert out.shape == (batch, hidden_channels, 1, 1), out.shape
    ref = x.reshape(batch, hidden_channels, 1, 1)
    assert jnp.allclose(out, ref, atol=1e-5), float(jnp.max(jnp.abs(out - ref)))

    # --- Test 2: random ("trained") weights vs a pure-JAX reference that ---
    # --- keeps the conv bias, verifying the bias really cancels under BN. ---
    c = hidden_channels
    w_real = 0.05 * jax.random.normal(k_w, (NUM_LAYERS, c, c), jnp.float32)  # (in, out)
    bias = jax.random.uniform(
        jax.random.PRNGKey(1), (NUM_LAYERS, c), jnp.float32, minval=-0.3, maxval=0.3
    )
    gamma = 1.0 + 0.1 * jax.random.normal(jax.random.PRNGKey(2), (NUM_LAYERS, c))
    beta = 0.1 * jax.random.normal(jax.random.PRNGKey(3), (NUM_LAYERS, c))

    w_pad2 = w_pad.at[:, :c, :c].set(w_real)
    gb_pad2 = gb_pad.at[:, 0, :c].set(gamma).at[:, 1, :c].set(beta)
    out2 = jax.block_until_ready(identity_mapping_forward(x, w_pad2, gb_pad2))

    def ref_forward(xin):
        h = xin
        for l in range(NUM_LAYERS):
            y = h @ w_real[l] + bias[l]                       # conv center tap + bias
            mean = jnp.mean(y, axis=0, keepdims=True)         # training-mode BN
            var = jnp.mean((y - mean) ** 2, axis=0, keepdims=True)
            h = gamma[l] * (y - mean) / jnp.sqrt(var + BN_EPS) + beta[l]
        return (h + xin).reshape(xin.shape[0], c, 1, 1)

    ref2 = ref_forward(x)
    err = float(jnp.max(jnp.abs(out2 - ref2)))
    assert jnp.allclose(out2, ref2, atol=2e-4, rtol=2e-4), err

    print("KERNEL_OK")
</pallas_src>

<mosaic_0001>
module attributes {stable_mosaic.version = 11 : i64} {
  func.func @_identity_mapping_kernel(%arg0: memref<8x128xf32, #tpu.memory_space<vmem>>, %arg1: memref<6x128x128xf32, #tpu.memory_space<vmem>>, %arg2: memref<6x2x128xf32, #tpu.memory_space<vmem>>, %arg3: memref<8x128xf32, #tpu.memory_space<vmem>>) attributes {dimension_semantics = [], scalar_prefetch = 0 : i64, scratch_operands = 0 : i64, tpu.core_type = #tpu.core_type<tc>} {
    %c0 = arith.constant 0 : index
    %c0_0 = arith.constant 0 : index
    %0 = vector.load %arg0[%c0, %c0_0] : memref<8x128xf32, #tpu.memory_space<vmem>>, vector<8x128xf32>
    %c0_1 = arith.constant 0 : index
    %c0_2 = arith.constant 0 : index
    %c0_3 = arith.constant 0 : index
    %1 = vector.load %arg1[%c0_1, %c0_2, %c0_3] : memref<6x128x128xf32, #tpu.memory_space<vmem>>, vector<1x128x128xf32>
    %2 = vector.shape_cast %1 : vector<1x128x128xf32> to vector<128x128xf32>
    %c0_4 = arith.constant 0 : index
    %c0_5 = arith.constant 0 : index
    %c0_6 = arith.constant 0 : index
    %3 = vector.load %arg2[%c0_4, %c0_5, %c0_6] : memref<6x2x128xf32, #tpu.memory_space<vmem>>, vector<1x2x128xf32>
    %4 = vector.shape_cast %3 : vector<1x2x128xf32> to vector<2x128xf32>
    %5 = vector.extract_strided_slice %4 {offsets = [0, 0], sizes = [1, 128], strides = [1, 1]} : vector<2x128xf32> to vector<1x128xf32>
    %6 = vector.extract_strided_slice %4 {offsets = [1, 0], sizes = [1, 128], strides = [1, 1]} : vector<2x128xf32> to vector<1x128xf32>
    %cst = arith.constant dense<0.000000e+00> : vector<8x128xf32>
    %7 = tpu.matmul %0, %2, %cst {dimension_numbers = #tpu.dot_dimension_numbers<[1], [0], [0], [1], [0, 0, 1, 1], [], []>} : vector<8x128xf32>, vector<128x128xf32>, vector<8x128xf32> -> vector<8x128xf32>
    %cst_7 = arith.constant dense<0.000000e+00> : vector<128xf32>
    %8 = vector.multi_reduction <add>, %7, %cst_7 [0] : vector<8x128xf32> to vector<128xf32>
    %9 = vector.shape_cast %8 : vector<128xf32> to vector<1x128xf32>
    %cst_8 = arith.constant 1.250000e-01 : f32
    %10 = vector.broadcast %cst_8 : f32 to vector<1x128xf32>
    %11 = arith.mulf %9, %10 : vector<1x128xf32>
    %12 = vector.broadcast %11 : vector<1x128xf32> to vector<8x128xf32>
    %13 = arith.subf %7, %12 : vector<8x128xf32>
    %14 = arith.mulf %13, %13 : vector<8x128xf32>
    %cst_9 = arith.constant dense<0.000000e+00> : vector<128xf32>
    %15 = vector.multi_reduction <add>, %14, %cst_9 [0] : vector<8x128xf32> to vector<128xf32>
    %16 = vector.shape_cast %15 : vector<128xf32> to vector<1x128xf32>
    %cst_10 = arith.constant 1.250000e-01 : f32
    %17 = vector.broadcast %cst_10 : f32 to vector<1x128xf32>
    %18 = arith.mulf %16, %17 : vector<1x128xf32>
    %cst_11 = arith.constant 9.99999974E-6 : f32
    %19 = vector.broadcast %cst_11 : f32 to vector<1x128xf32>
    %20 = arith.addf %18, %19 : vector<1x128xf32>
    %21 = math.rsqrt %20 : vector<1x128xf32>
    %22 = arith.mulf %5, %21 : vector<1x128xf32>
    %23 = vector.broadcast %22 : vector<1x128xf32> to vector<8x128xf32>
    %24 = arith.mulf %13, %23 : vector<8x128xf32>
    %25 = vector.broadcast %6 : vector<1x128xf32> to vector<8x128xf32>
    %26 = arith.addf %24, %25 : vector<8x128xf32>
    %c1 = arith.constant 1 : index
    %c0_12 = arith.constant 0 : index
    %c0_13 = arith.constant 0 : index
    %27 = vector.load %arg1[%c1, %c0_12, %c0_13] : memref<6x128x128xf32, #tpu.memory_space<vmem>>, vector<1x128x128xf32>
    %28 = vector.shape_cast %27 : vector<1x128x128xf32> to vector<128x128xf32>
    %c1_14 = arith.constant 1 : index
    %c0_15 = arith.constant 0 : index
    %c0_16 = arith.constant 0 : index
    %29 = vector.load %arg2[%c1_14, %c0_15, %c0_16] : memref<6x2x128xf32, #tpu.memory_space<vmem>>, vector<1x2x128xf32>
    %30 = vector.shape_cast %29 : vector<1x2x128xf32> to vector<2x128xf32>
    %31 = vector.extract_strided_slice %30 {offsets = [0, 0], sizes = [1, 128], strides = [1, 1]} : vector<2x128xf32> to vector<1x128xf32>
    %32 = vector.extract_strided_slice %30 {offsets = [1, 0], sizes = [1, 128], strides = [1, 1]} : vector<2x128xf32> to vector<1x128xf32>
    %cst_17 = arith.constant dense<0.000000e+00> : vector<8x128xf32>
    %33 = tpu.matmul %26, %28, %cst_17 {dimension_numbers = #tpu.dot_dimension_numbers<[1], [0], [0], [1], [0, 0, 1, 1], [], []>} : vector<8x128xf32>, vector<128x128xf32>, vector<8x128xf32> -> vector<8x128xf32>
    %cst_18 = arith.constant dense<0.000000e+00> : vector<128xf32>
    %34 = vector.multi_reduction <add>, %33, %cst_18 [0] : vector<8x128xf32> to vector<128xf32>
    %35 = vector.shape_cast %34 : vector<128xf32> to vector<1x128xf32>
    %cst_19 = arith.constant 1.250000e-01 : f32
    %36 = vector.broadcast %cst_19 : f32 to vector<1x128xf32>
    %37 = arith.mulf %35, %36 : vector<1x128xf32>
    %38 = vector.broadcast %37 : vector<1x128xf32> to vector<8x128xf32>
    %39 = arith.subf %33, %38 : vector<8x128xf32>
    %40 = arith.mulf %39, %39 : vector<8x128xf32>
    %cst_20 = arith.constant dense<0.000000e+00> : vector<128xf32>
    %41 = vector.multi_reduction <add>, %40, %cst_20 [0] : vector<8x128xf32> to vector<128xf32>
    %42 = vector.shape_cast %41 : vector<128xf32> to vector<1x128xf32>
    %cst_21 = arith.constant 1.250000e-01 : f32
    %43 = vector.broadcast %cst_21 : f32 to vector<1x128xf32>
    %44 = arith.mulf %42, %43 : vector<1x128xf32>
    %cst_22 = arith.constant 9.99999974E-6 : f32
    %45 = vector.broadcast %cst_22 : f32 to vector<1x128xf32>
    %46 = arith.addf %44, %45 : vector<1x128xf32>
    %47 = math.rsqrt %46 : vector<1x128xf32>
    %48 = arith.mulf %31, %47 : vector<1x128xf32>
    %49 = vector.broadcast %48 : vector<1x128xf32> to vector<8x128xf32>
    %50 = arith.mulf %39, %49 : vector<8x128xf32>
    %51 = vector.broadcast %32 : vector<1x128xf32> to vector<8x128xf32>
    %52 = arith.addf %50, %51 : vector<8x128xf32>
    %c2 = arith.constant 2 : index
    %c0_23 = arith.constant 0 : index
    %c0_24 = arith.constant 0 : index
    %53 = vector.load %arg1[%c2, %c0_23, %c0_24] : memref<6x128x128xf32, #tpu.memory_space<vmem>>, vector<1x128x128xf32>
    %54 = vector.shape_cast %53 : vector<1x128x128xf32> to vector<128x128xf32>
    %c2_25 = arith.constant 2 : index
    %c0_26 = arith.constant 0 : index
    %c0_27 = arith.constant 0 : index
    %55 = vector.load %arg2[%c2_25, %c0_26, %c0_27] : memref<6x2x128xf32, #tpu.memory_space<vmem>>, vector<1x2x128xf32>
    %56 = vector.shape_cast %55 : vector<1x2x128xf32> to vector<2x128xf32>
    %57 = vector.extract_strided_slice %56 {offsets = [0, 0], sizes = [1, 128], strides = [1, 1]} : vector<2x128xf32> to vector<1x128xf32>
    %58 = vector.extract_strided_slice %56 {offsets = [1, 0], sizes = [1, 128], strides = [1, 1]} : vector<2x128xf32> to vector<1x128xf32>
    %cst_28 = arith.constant dense<0.000000e+00> : vector<8x128xf32>
    %59 = tpu.matmul %52, %54, %cst_28 {dimension_numbers = #tpu.dot_dimension_numbers<[1], [0], [0], [1], [0, 0, 1, 1], [], []>} : vector<8x128xf32>, vector<128x128xf32>, vector<8x128xf32> -> vector<8x128xf32>
    %cst_29 = arith.constant dense<0.000000e+00> : vector<128xf32>
    %60 = vector.multi_reduction <add>, %59, %cst_29 [0] : vector<8x128xf32> to vector<128xf32>
    %61 = vector.shape_cast %60 : vector<128xf32> to vector<1x128xf32>
    %cst_30 = arith.constant 1.250000e-01 : f32
    %62 = vector.broadcast %cst_30 : f32 to vector<1x128xf32>
    %63 = arith.mulf %61, %62 : vector<1x128xf32>
    %64 = vector.broadcast %63 : vector<1x128xf32> to vector<8x128xf32>
    %65 = arith.subf %59, %64 : vector<8x128xf32>
    %66 = arith.mulf %65, %65 : vector<8x128xf32>
    %cst_31 = arith.constant dense<0.000000e+00> : vector<128xf32>
    %67 = vector.multi_reduction <add>, %66, %cst_31 [0] : vector<8x128xf32> to vector<128xf32>
    %68 = vector.shape_cast %67 : vector<128xf32> to vector<1x128xf32>
    %cst_32 = arith.constant 1.250000e-01 : f32
    %69 = vector.broadcast %cst_32 : f32 to vector<1x128xf32>
    %70 = arith.mulf %68, %69 : vector<1x128xf32>
    %cst_33 = arith.constant 9.99999974E-6 : f32
    %71 = vector.broadcast %cst_33 : f32 to vector<1x128xf32>
    %72 = arith.addf %70, %71 : vector<1x128xf32>
    %73 = math.rsqrt %72 : vector<1x128xf32>
    %74 = arith.mulf %57, %73 : vector<1x128xf32>
    %75 = vector.broadcast %74 : vector<1x128xf32> to vector<8x128xf32>
    %76 = arith.mulf %65, %75 : vector<8x128xf32>
    %77 = vector.broadcast %58 : vector<1x128xf32> to vector<8x128xf32>
    %78 = arith.addf %76, %77 : vector<8x128xf32>
    %c3 = arith.constant 3 : index
    %c0_34 = arith.constant 0 : index
    %c0_35 = arith.constant 0 : index
    %79 = vector.load %arg1[%c3, %c0_34, %c0_35] : memref<6x128x128xf32, #tpu.memory_space<vmem>>, vector<1x128x128xf32>
    %80 = vector.shape_cast %79 : vector<1x128x128xf32> to vector<128x128xf32>
    %c3_36 = arith.constant 3 : index
    %c0_37 = arith.constant 0 : index
    %c0_38 = arith.constant 0 : index
    %81 = vector.load %arg2[%c3_36, %c0_37, %c0_38] : memref<6x2x128xf32, #tpu.memory_space<vmem>>, vector<1x2x128xf32>
    %82 = vector.shape_cast %81 : vector<1x2x128xf32> to vector<2x128xf32>
    %83 = vector.extract_strided_slice %82 {offsets = [0, 0], sizes = [1, 128], strides = [1, 1]} : vector<2x128xf32> to vector<1x128xf32>
    %84 = vector.extract_strided_slice %82 {offsets = [1, 0], sizes = [1, 128], strides = [1, 1]} : vector<2x128xf32> to vector<1x128xf32>
    %cst_39 = arith.constant dense<0.000000e+00> : vector<8x128xf32>
    %85 = tpu.matmul %78, %80, %cst_39 {dimension_numbers = #tpu.dot_dimension_numbers<[1], [0], [0], [1], [0, 0, 1, 1], [], []>} : vector<8x128xf32>, vector<128x128xf32>, vector<8x128xf32> -> vector<8x128xf32>
    %cst_40 = arith.constant dense<0.000000e+00> : vector<128xf32>
    %86 = vector.multi_reduction <add>, %85, %cst_40 [0] : vector<8x128xf32> to vector<128xf32>
    %87 = vector.shape_cast %86 : vector<128xf32> to vector<1x128xf32>
    %cst_41 = arith.constant 1.250000e-01 : f32
    %88 = vector.broadcast %cst_41 : f32 to vector<1x128xf32>
    %89 = arith.mulf %87, %88 : vector<1x128xf32>
    %90 = vector.broadcast %89 : vector<1x128xf32> to vector<8x128xf32>
    %91 = arith.subf %85, %90 : vector<8x128xf32>
    %92 = arith.mulf %91, %91 : vector<8x128xf32>
    %cst_42 = arith.constant dense<0.000000e+00> : vector<128xf32>
    %93 = vector.multi_reduction <add>, %92, %cst_42 [0] : vector<8x128xf32> to vector<128xf32>
    %94 = vector.shape_cast %93 : vector<128xf32> to vector<1x128xf32>
    %cst_43 = arith.constant 1.250000e-01 : f32
    %95 = vector.broadcast %cst_43 : f32 to vector<1x128xf32>
    %96 = arith.mulf %94, %95 : vector<1x128xf32>
    %cst_44 = arith.constant 9.99999974E-6 : f32
    %97 = vector.broadcast %cst_44 : f32 to vector<1x128xf32>
    %98 = arith.addf %96, %97 : vector<1x128xf32>
    %99 = math.rsqrt %98 : vector<1x128xf32>
    %100 = arith.mulf %83, %99 : vector<1x128xf32>
    %101 = vector.broadcast %100 : vector<1x128xf32> to vector<8x128xf32>
    %102 = arith.mulf %91, %101 : vector<8x128xf32>
    %103 = vector.broadcast %84 : vector<1x128xf32> to vector<8x128xf32>
    %104 = arith.addf %102, %103 : vector<8x128xf32>
    %c4 = arith.constant 4 : index
    %c0_45 = arith.constant 0 : index
    %c0_46 = arith.constant 0 : index
    %105 = vector.load %arg1[%c4, %c0_45, %c0_46] : memref<6x128x128xf32, #tpu.memory_space<vmem>>, vector<1x128x128xf32>
    %106 = vector.shape_cast %105 : vector<1x128x128xf32> to vector<128x128xf32>
    %c4_47 = arith.constant 4 : index
    %c0_48 = arith.constant 0 : index
    %c0_49 = arith.constant 0 : index
    %107 = vector.load %arg2[%c4_47, %c0_48, %c0_49] : memref<6x2x128xf32, #tpu.memory_space<vmem>>, vector<1x2x128xf32>
    %108 = vector.shape_cast %107 : vector<1x2x128xf32> to vector<2x128xf32>
    %109 = vector.extract_strided_slice %108 {offsets = [0, 0], sizes = [1, 128], strides = [1, 1]} : vector<2x128xf32> to vector<1x128xf32>
    %110 = vector.extract_strided_slice %108 {offsets = [1, 0], sizes = [1, 128], strides = [1, 1]} : vector<2x128xf32> to vector<1x128xf32>
    %cst_50 = arith.constant dense<0.000000e+00> : vector<8x128xf32>
    %111 = tpu.matmul %104, %106, %cst_50 {dimension_numbers = #tpu.dot_dimension_numbers<[1], [0], [0], [1], [0, 0, 1, 1], [], []>} : vector<8x128xf32>, vector<128x128xf32>, vector<8x128xf32> -> vector<8x128xf32>
    %cst_51 = arith.constant dense<0.000000e+00> : vector<128xf32>
    %112 = vector.multi_reduction <add>, %111, %cst_51 [0] : vector<8x128xf32> to vector<128xf32>
    %113 = vector.shape_cast %112 : vector<128xf32> to vector<1x128xf32>
    %cst_52 = arith.constant 1.250000e-01 : f32
    %114 = vector.broadcast %cst_52 : f32 to vector<1x128xf32>
    %115 = arith.mulf %113, %114 : vector<1x128xf32>
    %116 = vector.broadcast %115 : vector<1x128xf32> to vector<8x128xf32>
    %117 = arith.subf %111, %116 : vector<8x128xf32>
    %118 = arith.mulf %117, %117 : vector<8x128xf32>
    %cst_53 = arith.constant dense<0.000000e+00> : vector<128xf32>
    %119 = vector.multi_reduction <add>, %118, %cst_53 [0] : vector<8x128xf32> to vector<128xf32>
    %120 = vector.shape_cast %119 : vector<128xf32> to vector<1x128xf32>
    %cst_54 = arith.constant 1.250000e-01 : f32
    %121 = vector.broadcast %cst_54 : f32 to vector<1x128xf32>
    %122 = arith.mulf %120, %121 : vector<1x128xf32>
    %cst_55 = arith.constant 9.99999974E-6 : f32
    %123 = vector.broadcast %cst_55 : f32 to vector<1x128xf32>
    %124 = arith.addf %122, %123 : vector<1x128xf32>
    %125 = math.rsqrt %124 : vector<1x128xf32>
    %126 = arith.mulf %109, %125 : vector<1x128xf32>
    %127 = vector.broadcast %126 : vector<1x128xf32> to vector<8x128xf32>
    %128 = arith.mulf %117, %127 : vector<8x128xf32>
    %129 = vector.broadcast %110 : vector<1x128xf32> to vector<8x128xf32>
    %130 = arith.addf %128, %129 : vector<8x128xf32>
    %c5 = arith.constant 5 : index
    %c0_56 = arith.constant 0 : index
    %c0_57 = arith.constant 0 : index
    %131 = vector.load %arg1[%c5, %c0_56, %c0_57] : memref<6x128x128xf32, #tpu.memory_space<vmem>>, vector<1x128x128xf32>
    %132 = vector.shape_cast %131 : vector<1x128x128xf32> to vector<128x128xf32>
    %c5_58 = arith.constant 5 : index
    %c0_59 = arith.constant 0 : index
    %c0_60 = arith.constant 0 : index
    %133 = vector.load %arg2[%c5_58, %c0_59, %c0_60] : memref<6x2x128xf32, #tpu.memory_space<vmem>>, vector<1x2x128xf32>
    %134 = vector.shape_cast %133 : vector<1x2x128xf32> to vector<2x128xf32>
    %135 = vector.extract_strided_slice %134 {offsets = [0, 0], sizes = [1, 128], strides = [1, 1]} : vector<2x128xf32> to vector<1x128xf32>
    %136 = vector.extract_strided_slice %134 {offsets = [1, 0], sizes = [1, 128], strides = [1, 1]} : vector<2x128xf32> to vector<1x128xf32>
    %cst_61 = arith.constant dense<0.000000e+00> : vector<8x128xf32>
    %137 = tpu.matmul %130, %132, %cst_61 {dimension_numbers = #tpu.dot_dimension_numbers<[1], [0], [0], [1], [0, 0, 1, 1], [], []>} : vector<8x128xf32>, vector<128x128xf32>, vector<8x128xf32> -> vector<8x128xf32>
    %cst_62 = arith.constant dense<0.000000e+00> : vector<128xf32>
    %138 = vector.multi_reduction <add>, %137, %cst_62 [0] : vector<8x128xf32> to vector<128xf32>
    %139 = vector.shape_cast %138 : vector<128xf32> to vector<1x128xf32>
    %cst_63 = arith.constant 1.250000e-01 : f32
    %140 = vector.broadcast %cst_63 : f32 to vector<1x128xf32>
    %141 = arith.mulf %139, %140 : vector<1x128xf32>
    %142 = vector.broadcast %141 : vector<1x128xf32> to vector<8x128xf32>
    %143 = arith.subf %137, %142 : vector<8x128xf32>
    %144 = arith.mulf %143, %143 : vector<8x128xf32>
    %cst_64 = arith.constant dense<0.000000e+00> : vector<128xf32>
    %145 = vector.multi_reduction <add>, %144, %cst_64 [0] : vector<8x128xf32> to vector<128xf32>
    %146 = vector.shape_cast %145 : vector<128xf32> to vector<1x128xf32>
    %cst_65 = arith.constant 1.250000e-01 : f32
    %147 = vector.broadcast %cst_65 : f32 to vector<1x128xf32>
    %148 = arith.mulf %146, %147 : vector<1x128xf32>
    %cst_66 = arith.constant 9.99999974E-6 : f32
    %149 = vector.broadcast %cst_66 : f32 to vector<1x128xf32>
    %150 = arith.addf %148, %149 : vector<1x128xf32>
    %151 = math.rsqrt %150 : vector<1x128xf32>
    %152 = arith.mulf %135, %151 : vector<1x128xf32>
    %153 = vector.broadcast %152 : vector<1x128xf32> to vector<8x128xf32>
    %154 = arith.mulf %143, %153 : vector<8x128xf32>
    %155 = vector.broadcast %136 : vector<1x128xf32> to vector<8x128xf32>
    %156 = arith.addf %154, %155 : vector<8x128xf32>
    %c0_67 = arith.constant 0 : index
    %c0_68 = arith.constant 0 : index
    %157 = vector.load %arg0[%c0_67, %c0_68] : memref<8x128xf32, #tpu.memory_space<vmem>>, vector<8x128xf32>
    %158 = arith.addf %156, %157 : vector<8x128xf32>
    %c0_69 = arith.constant 0 : index
    %c0_70 = arith.constant 0 : index
    %159 = vector.load %arg3[%c0_69, %c0_70] : memref<8x128xf32, #tpu.memory_space<vmem>>, vector<8x128xf32>
    tpu.vector_store %arg3[%c0_69, %c0_70], %158 {strides = array<i32>} : memref<8x128xf32, #tpu.memory_space<vmem>>, vector<8x128xf32>,
    return
  }
}

</mosaic_0001>

<bundles_post_ra>
// kernel: identity_mapping_forward.1
= control target key start
LH: loop header
LB: loop body
LE: loop exit
PB: predicated region body
PF: predicated region fallthrough
CT: control target
= control target key end

     0   :  { %8 = vsyncpa [#allocation3], 0  ;;  %s1433_s0 = inlined_call_operand.vmem [shape: f32[8,128], index: 0, kind: input, shape index: {}]   ;;  %s1434_s1 = inlined_call_operand.hbm [shape: f32[6,128,128], index: 1, kind: input, shape index: {}]   ;;  %s1435_s2 = inlined_call_operand.vmem [shape: f32[6,2,128], index: 2, kind: input, shape index: {}]   ;;  %s1436_s3 = inlined_call_operand.hbm [shape: f32[8,128], index: 3, kind: output, shape index: {}]  }
   0x1   :  { %9 = vsyncpa [#allocation4], 0  ;;  %s1281_s12 = smov [#allocation2]   ;;  %s1233_s16 = scalar_lea.hbm %s1434_s1, 12288 }
   0x2   :  { %s17_s13 = sshll.u32 %s1281_s12, 4  ;;  %p1234_p0 = scmp.ne.s32.totalorder %s1434_s1, %s1233_s16  ;;  %s18_s13 = int_to_ptr.vmem [resolvable:$true] %s17_s13 }
   0x3   :  { %p1237_p1 = scmp.lt.u32.totalorder %s1233_s16, %s1434_s1 }
   0x5   :  { %p1239_p2 = pnand %p1237_p1, %p1234_p0 }
   0x7   :  { %1242 = shalt.err (!%p1239_p2)
}
   0x8   :  { %s1243_s21 = scalar_lea.vmem %s18_s13, 12288  ;;  %p1248_p4 = scmp.lt.s32.totalorder %s18_s13, %s18_s13 }
   0x9   :  { %p1244_p3 = scmp.ne.s32.totalorder %s18_s13, %s1243_s21  ;;  %p1249_p5 = scmp.lt.s32.totalorder %s1243_s21, %s1243_s21 }
   0xb   :  { %p1250_p6 = por %p1249_p5, %p1248_p4 }
   0xd   :  { %p1251_p7 = pnand %p1250_p6, %p1244_p3 }
   0xf   :  { %1254 = shalt.err (!%p1251_p7)
}
  0x10   :  { %s1282_s22 = smov 128   ;;  %s1283_s23 = smov 8  }
  0x11   :  { %23 = dma.hbm_to_vmem [thread:$0]  %s1434_s1, 12288, %s18_s13, [#allocation3], %s1282_s22, %s1282_s22, %s1283_s23  }
  0x12   :  { %1277 = dma.done.wait [#allocation3], 12288  }
  0x13   :  { %1278 = vsyncadd [#allocation3], 4294955008  ;;  %v1284_v0 = vmov 0.0|0.0   ;;  %vm1285_vm0 = vmmov 0   ;;  %v1286_v1 = vmov 0.0   ;;  %v30_v2 = vld [vmem:[#allocation2] sm:$0xff] }
  0x14   :  { %1070 = vmatprep.subr.bf16.mxu0 %v1284_v0  ;;  %892 = vmatprep.mubr.msk.f32.mxu0 %vm1285_vm0, %v1286_v1  ;;  %v31_v3 = vld [vmem:[#allocation2 + $0x8] sm:$0xff]  ;;  %v32_v4 = vld [vmem:[#allocation2 + $0x10] sm:$0xff]  ;;  %v33_v6 = vld [vmem:[#allocation2 + $0x18] sm:$0xff]  ;;  %s1287_s11 = smov [#allocation5]  }
  0x15   :  { %1094 = vmatprep.subr.bf16.mxu1 %v1284_v0  ;;  %927 = vmatprep.mubr.msk.f32.mxu1 %vm1285_vm0, %v1286_v1  ;;  %v1071_v5 = vpack.c.bf16 %v31_v3, %v30_v2  ;;  %v1074_v7 = vpack.c.bf16 %v33_v6, %v32_v4  ;;  %v34_v8 = vld [vmem:[#allocation2 + $0x20] sm:$0xff]  ;;  %v35_v9 = vld [vmem:[#allocation2 + $0x28] sm:$0xff]  ;;  %v36_v11 = vld [vmem:[#allocation2 + $0x30] sm:$0xff]  ;;  %s744_s12 = sshll.u32 %s1287_s11, 4  ;;  %s745_s12 = int_to_ptr.vmem [resolvable:$true] %s744_s12 }
  0x16   :  { %v1077_v10 = vpack.c.bf16 %v35_v9, %v34_v8  ;;  %v37_v12 = vld [vmem:[#allocation2 + $0x38] sm:$0xff]  ;;  %v38_v14 = vld [vmem:[#allocation2 + $0x40] sm:$0xff]  ;;  %v39_v15 = vld [vmem:[#allocation2 + $0x48] sm:$0xff]  ;;  %v136_v8 = vlaneseq  ;;  %s1255_s13 = scalar_lea.vmem %s745_s12, 128  ;;  %p1260_p9 = scmp.lt.s32.totalorder %s745_s12, %s745_s12 }
  0x17   :  { %1072 = vmatpush3.bf16.msra.mxu0 %v1071_v5  ;;  %v1080_v13 = vpack.c.bf16 %v37_v12, %v36_v11  ;;  %v1083_v16 = vpack.c.bf16 %v39_v15, %v38_v14  ;;  %v40_v17 = vld [vmem:[#allocation2 + $0x50] sm:$0xff]  ;;  %v41_v18 = vld [vmem:[#allocation2 + $0x58] sm:$0xff]  ;;  %v42_v20 = vld [vmem:[#allocation2 + $0x60] sm:$0xff]  ;;  %p1256_p8 = scmp.ne.s32.totalorder %s745_s12, %s1255_s13  ;;  %p1261_p10 = scmp.lt.s32.totalorder %s1255_s13, %s1255_s13 }
  0x18   :  { %1073 = vmatprep.subr.bf16.mxu0 %v1284_v0  ;;  %v1086_v19 = vpack.c.bf16 %v41_v18, %v40_v17  ;;  %v43_v21 = vld [vmem:[#allocation2 + $0x68] sm:$0xff]  ;;  %v44_v23 = vld [vmem:[#allocation2 + $0x70] sm:$0xff]  ;;  %v45_v24 = vld [vmem:[#allocation2 + $0x78] sm:$0xff]  ;;  %v137_v9 = vshrl.u32 %v136_v8, 7 }
  0x19   :  { %v1089_v22 = vpack.c.bf16 %v43_v21, %v42_v20  ;;  %v1092_v25 = vpack.c.bf16 %v45_v24, %v44_v23  ;;  %v1336_v26 = vld [vmem:[%s1433_s0] sm:$0xff]  ;;  %v147_v27 = vld [vmem:[#allocation2 + $0x80] sm:$0xff]  ;;  %v148_v28 = vld [vmem:[#allocation2 + $0x88] sm:$0xff]  ;;  %p1262_p11 = por %p1261_p10, %p1260_p9 }
  0x1a   :  { %v1095_v29 = vpack.c.bf16 %v148_v28, %v147_v27  ;;  %v149_v30 = vld [vmem:[#allocation2 + $0x90] sm:$0xff]  ;;  %v150_v31 = vld [vmem:[#allocation2 + $0x98] sm:$0xff]  ;;  %v151_v33 = vld [vmem:[#allocation2 + $0xa0] sm:$0xff]  ;;  %v1353_v11 = vsub.s32 0, %v137_v9  ;;  %v1355_v12 = vsub.s32 1, %v137_v9 }
  0x1b   :  { %1075 = vmatpush3.bf16.msra.mxu0 %v1074_v7  ;;  %v1098_v32 = vpack.c.bf16 %v150_v31, %v149_v30  ;;  %v152_v34 = vld [vmem:[#allocation2 + $0xa8] sm:$0xff]  ;;  %v153_v36 = vld [vmem:[#allocation2 + $0xb0] sm:$0xff]  ;;  %v154_v37 = vld [vmem:[#allocation2 + $0xb8] sm:$0xff]  ;;  %p1263_p12 = pnand %p1262_p11, %p1256_p8 }
  0x1c   :  { %1076 = vmatprep.subr.bf16.mxu0 %v1284_v0  ;;  %1096 = vmatpush3.bf16.msra.mxu1 %v1095_v29  ;;  %v1101_v35 = vpack.c.bf16 %v152_v34, %v151_v33  ;;  %v1104_v38 = vpack.c.bf16 %v154_v37, %v153_v36  ;;  %v155_v39 = vld [vmem:[#allocation2 + $0xc0] sm:$0xff]  ;;  %v156_v40 = vld [vmem:[#allocation2 + $0xc8] sm:$0xff]  ;;  %v157_v42 = vld [vmem:[#allocation2 + $0xd0] sm:$0xff] }
  0x1d   :  { %1097 = vmatprep.subr.bf16.mxu1 %v1284_v0  ;;  %v1107_v41 = vpack.c.bf16 %v156_v40, %v155_v39  ;;  %v158_v43 = vld [vmem:[#allocation2 + $0xd8] sm:$0xff]  ;;  %v159_v45 = vld [vmem:[#allocation2 + $0xe0] sm:$0xff]  ;;  %v160_v46 = vld [vmem:[#allocation2 + $0xe8] sm:$0xff] }
  0x1e   :  { %v1110_v44 = vpack.c.bf16 %v158_v43, %v157_v42  ;;  %v1113_v47 = vpack.c.bf16 %v160_v46, %v159_v45  ;;  %v161_v48 = vld [vmem:[#allocation2 + $0xf0] sm:$0xff]  ;;  %v162_v49 = vld [vmem:[#allocation2 + $0xf8] sm:$0xff]  ;;  %v266_v20 = vld [vmem:[#allocation2 + $0x108] sm:$0xff] }
  0x1f   :  { %1078 = vmatpush3.bf16.msra.mxu0 %v1077_v10  ;;  %v1116_v50 = vpack.c.bf16 %v162_v49, %v161_v48  ;;  %v46_v10 = vld [vmem:[%s1435_s2] sm:$0x3]  ;;  %v268_v23 = vld [vmem:[#allocation2 + $0x118] sm:$0xff]  ;;  %v270_v27 = vld [vmem:[#allocation2 + $0x128] sm:$0xff] }
  0x20   :  { %1079 = vmatprep.subr.bf16.mxu0 %v1284_v0  ;;  %1099 = vmatpush3.bf16.msra.mxu1 %v1098_v32  ;;  %v271_v29 = vld [vmem:[#allocation2 + $0x130] sm:$0xff]  ;;  %v272_v30 = vld [vmem:[#allocation2 + $0x138] sm:$0xff]  ;;  %v273_v32 = vld [vmem:[#allocation2 + $0x140] sm:$0xff] }
  0x21   :  { %1100 = vmatprep.subr.bf16.mxu1 %v1284_v0  ;;  %v1128_v31 = vpack.c.bf16 %v272_v30, %v271_v29  ;;  %v274_v33 = vld [vmem:[#allocation2 + $0x148] sm:$0xff]  ;;  %v276_v36 = vld [vmem:[#allocation2 + $0x158] sm:$0xff]  ;;  %v383_v8 = vld [vmem:[#allocation2 + $0x180] sm:$0xff] }
  0x22   :  { %v1131_v34 = vpack.c.bf16 %v274_v33, %v273_v32  ;;  %v278_v39 = vld [vmem:[#allocation2 + $0x168] sm:$0xff]  ;;  %v280_v42 = vld [vmem:[#allocation2 + $0x178] sm:$0xff]  ;;  %v395_v29 = vld [vmem:[#allocation2 + $0x1e0] sm:$0xff] }
  0x23   :  { %1081 = vmatpush3.bf16.msra.mxu0 %v1080_v13  ;;  %v384_v9 = vld [vmem:[#allocation2 + $0x188] sm:$0xff]  ;;  %v397_v32 = vld [vmem:[#allocation2 + $0x1f0] sm:$0xff]  ;;  %v398_v33 = vld [vmem:[#allocation2 + $0x1f8] sm:$0xff] }
  0x24   :  { %1082 = vmatprep.subr.bf16.mxu0 %v1284_v0  ;;  %1102 = vmatpush3.bf16.msra.mxu1 %v1101_v35  ;;  %v275_v35 = vld [vmem:[#allocation2 + $0x150] sm:$0xff]  ;;  %v396_v30 = vld [vmem:[#allocation2 + $0x1e8] sm:$0xff] }
  0x25   :  { %1103 = vmatprep.subr.bf16.mxu1 %v1284_v0  ;;  %v1134_v37 = vpack.c.bf16 %v276_v36, %v275_v35 }
  0x27   :  { %1084 = vmatpush3.bf16.msra.mxu0 %v1083_v16  ;;  %v144_v16 = vrot.slane %v46_v10, %v1355_v12 }
  0x28   :  { %1085 = vmatprep.subr.bf16.mxu0 %v1284_v0  ;;  %1105 = vmatpush3.bf16.msra.mxu1 %v1104_v38  ;;  %v277_v38 = vld [vmem:[#allocation2 + $0x160] sm:$0xff] }
  0x29   :  { %1106 = vmatprep.subr.bf16.mxu1 %v1284_v0  ;;  %v1137_v40 = vpack.c.bf16 %v278_v39, %v277_v38 }
  0x2b   :  { %1087 = vmatpush3.bf16.msra.mxu0 %v1086_v19  ;;  %v265_v19 = vld [vmem:[#allocation2 + $0x100] sm:$0xff] }
  0x2c   :  { %1088 = vmatprep.subr.bf16.mxu0 %v1284_v0  ;;  %1108 = vmatpush3.bf16.msra.mxu1 %v1107_v41  ;;  %v1119_v21 = vpack.c.bf16 %v266_v20, %v265_v19  ;;  %v279_v41 = vld [vmem:[#allocation2 + $0x170] sm:$0xff]  ;;  %v390_v20 = vld [vmem:[#allocation2 + $0x1b8] sm:$0xff] }
  0x2d   :  { %1109 = vmatprep.subr.bf16.mxu1 %v1284_v0  ;;  %v1140_v43 = vpack.c.bf16 %v280_v42, %v279_v41  ;;  %v389_v19 = vld [vmem:[#allocation2 + $0x1b0] sm:$0xff] }
  0x2f   :  { %1090 = vmatpush3.bf16.msra.mxu0 %v1089_v22  ;;  %v267_v22 = vld [vmem:[#allocation2 + $0x110] sm:$0xff] }
  0x30   :  { %1091 = vmatprep.subr.bf16.mxu0 %v1284_v0  ;;  %1111 = vmatpush3.bf16.msra.mxu1 %v1110_v44  ;;  %v1122_v24 = vpack.c.bf16 %v268_v23, %v267_v22  ;;  %v391_v22 = vld [vmem:[#allocation2 + $0x1c0] sm:$0xff]  ;;  %v392_v23 = vld [vmem:[#allocation2 + $0x1c8] sm:$0xff] }
  0x31   :  { %1112 = vmatprep.subr.bf16.mxu1 %v1284_v0 }
  0x33   :  { %1093 = vmatpush3.bf16.msra.mxu0 %v1092_v25  ;;  %v269_v25 = vld [vmem:[#allocation2 + $0x120] sm:$0xff] }
  0x34   :  { %1118 = vmatprep.subr.bf16.mxu0 %v1284_v0  ;;  %1114 = vmatpush3.bf16.msra.mxu1 %v1113_v47  ;;  %v1125_v28 = vpack.c.bf16 %v270_v27, %v269_v25  ;;  %v393_v25 = vld [vmem:[#allocation2 + $0x1d0] sm:$0xff]  ;;  %v394_v27 = vld [vmem:[#allocation2 + $0x1d8] sm:$0xff] }
  0x35   :  { %1115 = vmatprep.subr.bf16.mxu1 %v1284_v0 }
  0x36   :  { %893 = vmatmul.mubr.f32.vlgmr.msra.gmra.mrb[0].mxu0 %v1336_v26 }
  0x37   :  { %962 = vmatprep.mubr.msk.f32.mxu0 %vm1285_vm0, %v1286_v1  ;;  %1120 = vmatpush3.bf16.msra.mxu0 %v1119_v21  ;;  %v1152_v21 = vpack.c.bf16 %v390_v20, %v389_v19  ;;  %v514_v19 = vld [vmem:[#allocation2 + $0x268] sm:$0xff] }
  0x38   :  { %1117 = vmatpush3.bf16.msra.mxu1 %v1116_v50  ;;  %1121 = vmatprep.subr.bf16.mxu0 %v1284_v0 }
  0x39   :  { %1142 = vmatprep.subr.bf16.mxu1 %v1284_v0 }
  0x3b   :  { %1123 = vmatpush3.bf16.msra.mxu0 %v1122_v24  ;;  %v1155_v24 = vpack.c.bf16 %v392_v23, %v391_v22  ;;  %v516_v22 = vld [vmem:[#allocation2 + $0x278] sm:$0xff] }
  0x3c   :  { %1124 = vmatprep.subr.bf16.mxu0 %v1284_v0 }
  0x3f   :  { %1126 = vmatpush3.bf16.msra.mxu0 %v1125_v28  ;;  %v1158_v28 = vpack.c.bf16 %v394_v27, %v393_v25 }
  0x40   :  { %1127 = vmatprep.subr.bf16.mxu0 %v1284_v0 }
  0x43   :  { %1129 = vmatpush3.bf16.msra.mxu0 %v1128_v31  ;;  %v1161_v31 = vpack.c.bf16 %v396_v30, %v395_v29 }
  0x44   :  { %1130 = vmatprep.subr.bf16.mxu0 %v1284_v0 }
  0x47   :  { %1132 = vmatpush3.bf16.msra.mxu0 %v1131_v34  ;;  %v1164_v34 = vpack.c.bf16 %v398_v33, %v397_v32 }
  0x48   :  { %1133 = vmatprep.subr.bf16.mxu0 %v1284_v0 }
  0x4b   :  { %1135 = vmatpush3.bf16.msra.mxu0 %v1134_v37 }
  0x4c   :  { %1136 = vmatprep.subr.bf16.mxu0 %v1284_v0 }
  0x4f   :  { %1138 = vmatpush3.bf16.msra.mxu0 %v1137_v40 }
  0x50   :  { %1139 = vmatprep.subr.bf16.mxu0 %v1284_v0 }
  0x53   :  { %1141 = vmatpush3.bf16.msra.mxu0 %v1140_v43 }
  0x54   :  { %1166 = vmatprep.subr.bf16.mxu0 %v1284_v0 }
 0x109   :  { %v113_v51 = vpop.f32.mrb[0].mxu0 }
 0x10a   :  { %v117_v52 = vrot.slane %v113_v51, 4  ;;  %v894_v53 = vpop.f32.mrb[1].mxu0 }
 0x10c   :  { %v118_v54 = vadd.f32 %v117_v52, %v113_v51 }
 0x10e   :  { %v119_v55 = vrot.slane %v118_v54, 2 }
 0x110   :  { %v120_v56 = vadd.f32 %v119_v55, %v118_v54 }
 0x112   :  { %v121_v57 = vrot.slane %v120_v56, 1 }
 0x114   :  { %v122_v58 = vadd.f32 %v121_v57, %v120_v56 }
 0x116   :  { %v123_v59 = vmul.f32 0.125, %v122_v58 }
 0x118   :  { %v124_v60 = vsub.f32 %v113_v51, %v123_v59 }
 0x11a   :  { %v125_v61 = vmul.f32 %v124_v60, %v124_v60 }
 0x11c   :  { %v126_v62 = vrot.slane %v125_v61, 4 }
 0x11e   :  { %v127_v63 = vadd.f32 %v126_v62, %v125_v61 }
 0x120   :  { %v128_v2 = vrot.slane %v127_v63, 2 }
 0x122   :  { %v129_v3 = vadd.f32 %v128_v2, %v127_v63  ;;  %v753_v63 = vld [vmem:[%s1435_s2 + $0x2] sm:$0x3] }
 0x124   :  { %v130_v4 = vrot.slane %v129_v3, 1 }
 0x126   :  { %v131_v5 = vadd.f32 %v130_v4, %v129_v3 }
 0x128   :  { %v132_v6 = vmul.f32 0.125, %v131_v5  ;;  %v262_v5 = vrot.slane %v753_v63, %v1355_v12 }
 0x12a   :  { %v133_v7 = vadd.f32 1e-05, %v132_v6 }
 0x12c   :  { %1221 = vrsqrt.f32 %v133_v7 }
 0x136   :  { %v1222_v13 = vpop.eup %1221 }
 0x137   :  { %v135_v14 = vmul.f32 %v1222_v13, %v46_v10  ;;  %v1143_v10 = vpack.c.bf16 %v384_v9, %v383_v8  ;;  %v385_v13 = vld [vmem:[#allocation2 + $0x190] sm:$0xff] }
 0x138   :  { %v507_v8 = vld [vmem:[#allocation2 + $0x230] sm:$0xff] }
 0x139   :  { %v139_v15 = vrot.slane %v135_v14, %v1353_v11  ;;  %v386_v14 = vld [vmem:[#allocation2 + $0x198] sm:$0xff] }
 0x13b   :  { %v140_v17 = vmul.f32 %v139_v15, %v124_v60  ;;  %v1146_v15 = vpack.c.bf16 %v386_v14, %v385_v13  ;;  %v510_v13 = vld [vmem:[#allocation2 + $0x248] sm:$0xff] }
 0x13d   :  { %v145_v18 = vadd.f32 %v144_v16, %v140_v17  ;;  %v387_v16 = vld [vmem:[#allocation2 + $0x1a0] sm:$0xff]  ;;  %v388_v17 = vld [vmem:[#allocation2 + $0x1a8] sm:$0xff] }
 0x13f   :  { %928 = vmatmul.mubr.f32.vlgmr.msra.gmra.mrb[0].mxu1 %v145_v18  ;;  %v1149_v18 = vpack.c.bf16 %v388_v17, %v387_v16  ;;  %v512_v16 = vld [vmem:[#allocation2 + $0x258] sm:$0xff] }
 0x140   :  { %997 = vmatprep.mubr.msk.f32.mxu1 %vm1285_vm0, %v1286_v1  ;;  %1144 = vmatpush3.bf16.msra.mxu1 %v1143_v10  ;;  %v509_v10 = vld [vmem:[#allocation2 + $0x240] sm:$0xff] }
 0x141   :  { %1145 = vmatprep.subr.bf16.mxu1 %v1284_v0  ;;  %v1179_v14 = vpack.c.bf16 %v510_v13, %v509_v10  ;;  %v634_v10 = vld [vmem:[#allocation2 + $0x2f8] sm:$0xff] }
 0x144   :  { %1147 = vmatpush3.bf16.msra.mxu1 %v1146_v15  ;;  %v511_v15 = vld [vmem:[#allocation2 + $0x250] sm:$0xff] }
 0x145   :  { %1148 = vmatprep.subr.bf16.mxu1 %v1284_v0  ;;  %v1182_v17 = vpack.c.bf16 %v512_v16, %v511_v15 }
 0x148   :  { %1150 = vmatpush3.bf16.msra.mxu1 %v1149_v18  ;;  %v513_v18 = vld [vmem:[#allocation2 + $0x260] sm:$0xff] }
 0x149   :  { %1151 = vmatprep.subr.bf16.mxu1 %v1284_v0  ;;  %v1185_v20 = vpack.c.bf16 %v514_v19, %v513_v18 }
 0x14c   :  { %1153 = vmatpush3.bf16.msra.mxu1 %v1152_v21  ;;  %v515_v21 = vld [vmem:[#allocation2 + $0x270] sm:$0xff] }
 0x14d   :  { %1154 = vmatprep.subr.bf16.mxu1 %v1284_v0  ;;  %v1188_v23 = vpack.c.bf16 %v516_v22, %v515_v21 }
 0x150   :  { %1156 = vmatpush3.bf16.msra.mxu1 %v1155_v24 }
 0x151   :  { %1157 = vmatprep.subr.bf16.mxu1 %v1284_v0 }
 0x154   :  { %1159 = vmatpush3.bf16.msra.mxu1 %v1158_v28 }
 0x155   :  { %1160 = vmatprep.subr.bf16.mxu1 %v1284_v0 }
 0x158   :  { %1162 = vmatpush3.bf16.msra.mxu1 %v1161_v31 }
 0x159   :  { %1163 = vmatprep.subr.bf16.mxu1 %v1284_v0 }
 0x15c   :  { %1165 = vmatpush3.bf16.msra.mxu1 %v1164_v34 }
 0x15d   :  { %1190 = vmatprep.subr.bf16.mxu1 %v1284_v0 }
 0x212   :  { %v231_v44 = vpop.f32.mrb[0].mxu1 }
 0x213   :  { %v235_v45 = vrot.slane %v231_v44, 4  ;;  %v929_v46 = vpop.f32.mrb[1].mxu1 }
 0x215   :  { %v236_v47 = vadd.f32 %v235_v45, %v231_v44 }
 0x217   :  { %v237_v48 = vrot.slane %v236_v47, 2 }
 0x219   :  { %v238_v49 = vadd.f32 %v237_v48, %v236_v47 }
 0x21b   :  { %v239_v50 = vrot.slane %v238_v49, 1 }
 0x21d   :  { %v240_v51 = vadd.f32 %v239_v50, %v238_v49 }
 0x21f   :  { %v241_v52 = vmul.f32 0.125, %v240_v51 }
 0x221   :  { %v242_v53 = vsub.f32 %v231_v44, %v241_v52 }
 0x223   :  { %v243_v54 = vmul.f32 %v242_v53, %v242_v53 }
 0x225   :  { %v244_v55 = vrot.slane %v243_v54, 4 }
 0x227   :  { %v245_v56 = vadd.f32 %v244_v55, %v243_v54  ;;  %v754_v54 = vld [vmem:[%s1435_s2 + $0x4] sm:$0x3] }
 0x229   :  { %v246_v57 = vrot.slane %v245_v56, 2 }
 0x22b   :  { %v247_v58 = vadd.f32 %v246_v57, %v245_v56 }
 0x22d   :  { %v248_v59 = vrot.slane %v247_v58, 1 }
 0x22f   :  { %v249_v60 = vadd.f32 %v248_v59, %v247_v58  ;;  %v380_v58 = vrot.slane %v754_v54, %v1355_v12 }
 0x231   :  { %v250_v61 = vmul.f32 0.125, %v249_v60 }
 0x233   :  { %v251_v62 = vadd.f32 1e-05, %v250_v61  ;;  %v501_v61 = vld [vmem:[#allocation2 + $0x200] sm:$0xff] }
 0x235   :  { %1223 = vrsqrt.f32 %v251_v62  ;;  %v502_v62 = vld [vmem:[#allocation2 + $0x208] sm:$0xff] }
 0x23f   :  { %v1224_v2 = vpop.eup %1223 }
 0x240   :  { %v253_v3 = vmul.f32 %v1224_v2, %v753_v63  ;;  %v1167_v63 = vpack.c.bf16 %v502_v62, %v501_v61  ;;  %v503_v2 = vld [vmem:[#allocation2 + $0x210] sm:$0xff]  ;;  %v626_v61 = vld [vmem:[#allocation2 + $0x2b8] sm:$0xff] }
 0x242   :  { %v257_v4 = vrot.slane %v253_v3, %v1353_v11  ;;  %v504_v3 = vld [vmem:[#allocation2 + $0x218] sm:$0xff] }
 0x244   :  { %v258_v6 = vmul.f32 %v257_v4, %v242_v53  ;;  %v1170_v4 = vpack.c.bf16 %v504_v3, %v503_v2  ;;  %v628_v2 = vld [vmem:[#allocation2 + $0x2c8] sm:$0xff] }
 0x246   :  { %v263_v7 = vadd.f32 %v262_v5, %v258_v6  ;;  %v505_v5 = vld [vmem:[#allocation2 + $0x220] sm:$0xff]  ;;  %v506_v6 = vld [vmem:[#allocation2 + $0x228] sm:$0xff] }
 0x248   :  { %963 = vmatmul.mubr.f32.vlgmr.msra.gmra.mrb[2].mxu0 %v263_v7  ;;  %v1173_v7 = vpack.c.bf16 %v506_v6, %v505_v5  ;;  %v630_v5 = vld [vmem:[#allocation2 + $0x2d8] sm:$0xff] }
 0x249   :  { %1032 = vmatprep.mubr.msk.f32.mxu0 %vm1285_vm0, %v1286_v1  ;;  %1168 = vmatpush3.bf16.msra.mxu0 %v1167_v63  ;;  %v627_v63 = vld [vmem:[#allocation2 + $0x2c0] sm:$0xff] }
 0x24a   :  { %1169 = vmatprep.subr.bf16.mxu0 %v1284_v0  ;;  %v1203_v3 = vpack.c.bf16 %v628_v2, %v627_v63 }
 0x24d   :  { %1171 = vmatpush3.bf16.msra.mxu0 %v1170_v4  ;;  %v629_v4 = vld [vmem:[#allocation2 + $0x2d0] sm:$0xff] }
 0x24e   :  { %1172 = vmatprep.subr.bf16.mxu0 %v1284_v0  ;;  %v1206_v6 = vpack.c.bf16 %v630_v5, %v629_v4 }
 0x251   :  { %1174 = vmatpush3.bf16.msra.mxu0 %v1173_v7  ;;  %v631_v7 = vld [vmem:[#allocation2 + $0x2e0] sm:$0xff] }
 0x252   :  { %1175 = vmatprep.subr.bf16.mxu0 %v1284_v0 }
 0x31b   :  { %v349_v35 = vpop.f32.mrb[2].mxu0 }
 0x31c   :  { %v353_v36 = vrot.slane %v349_v35, 4  ;;  %v964_v37 = vpop.f32.mrb[3].mxu0 }
 0x31e   :  { %v354_v38 = vadd.f32 %v353_v36, %v349_v35 }
 0x320   :  { %v355_v39 = vrot.slane %v354_v38, 2 }
 0x322   :  { %v356_v40 = vadd.f32 %v355_v39, %v354_v38 }
 0x324   :  { %v357_v41 = vrot.slane %v356_v40, 1 }
 0x326   :  { %v358_v42 = vadd.f32 %v357_v41, %v356_v40 }
 0x328   :  { %v359_v43 = vmul.f32 0.125, %v358_v42 }
 0x32a   :  { %v360_v44 = vsub.f32 %v349_v35, %v359_v43 }
 0x32c   :  { %v361_v45 = vmul.f32 %v360_v44, %v360_v44 }
 0x32e   :  { %v362_v46 = vrot.slane %v361_v45, 4 }
 0x330   :  { %v363_v47 = vadd.f32 %v362_v46, %v361_v45 }
 0x332   :  { %v364_v48 = vrot.slane %v363_v47, 2 }
 0x334   :  { %v365_v49 = vadd.f32 %v364_v48, %v363_v47 }
 0x336   :  { %v366_v50 = vrot.slane %v365_v49, 1 }
 0x338   :  { %v367_v51 = vadd.f32 %v366_v50, %v365_v49 }
 0x33a   :  { %v368_v52 = vmul.f32 0.125, %v367_v51  ;;  %v619_v51 = vld [vmem:[#allocation2 + $0x280] sm:$0xff] }
 0x33c   :  { %v369_v53 = vadd.f32 1e-05, %v368_v52  ;;  %v620_v52 = vld [vmem:[#allocation2 + $0x288] sm:$0xff] }
 0x33e   :  { %1225 = vrsqrt.f32 %v369_v53  ;;  %v1191_v53 = vpack.c.bf16 %v620_v52, %v619_v51 }
 0x348   :  { %v1226_v55 = vpop.eup %1225 }
 0x349   :  { %v371_v56 = vmul.f32 %v1226_v55, %v754_v54  ;;  %v621_v54 = vld [vmem:[#allocation2 + $0x290] sm:$0xff]  ;;  %v622_v55 = vld [vmem:[#allocation2 + $0x298] sm:$0xff] }
 0x34b   :  { %v375_v57 = vrot.slane %v371_v56, %v1353_v11  ;;  %v1194_v56 = vpack.c.bf16 %v622_v55, %v621_v54 }
 0x34d   :  { %v376_v59 = vmul.f32 %v375_v57, %v360_v44  ;;  %v755_v44 = vld [vmem:[%s1435_s2 + $0x6] sm:$0x3]  ;;  %v623_v57 = vld [vmem:[#allocation2 + $0x2a0] sm:$0xff] }
 0x34e   :  { %v498_v48 = vrot.slane %v755_v44, %v1355_v12 }
 0x34f   :  { %v381_v60 = vadd.f32 %v380_v58, %v376_v59  ;;  %v624_v58 = vld [vmem:[#allocation2 + $0x2a8] sm:$0xff] }
 0x350   :  { %v1197_v59 = vpack.c.bf16 %v624_v58, %v623_v57 }
 0x351   :  { %998 = vmatmul.mubr.f32.vlgmr.msra.gmra.mrb[2].mxu1 %v381_v60  ;;  %v625_v60 = vld [vmem:[#allocation2 + $0x2b0] sm:$0xff] }
 0x352   :  { %1067 = vmatprep.mubr.msk.f32.mxu1 %vm1285_vm0, %v1286_v1  ;;  %v508_v1 = vld [vmem:[#allocation2 + $0x238] sm:$0xff]  ;;  %1192 = vmatpush3.bf16.msra.mxu1 %v1191_v53  ;;  %v1200_v62 = vpack.c.bf16 %v626_v61, %v625_v60 }
 0x353   :  { %v1176_v9 = vpack.c.bf16 %v508_v1, %v507_v8  ;;  %1193 = vmatprep.subr.bf16.mxu1 %v1284_v0  ;;  %v632_v8 = vld [vmem:[#allocation2 + $0x2e8] sm:$0xff] }
 0x354   :  { %v1209_v1 = vpack.c.bf16 %v632_v8, %v631_v7 }
 0x355   :  { %1177 = vmatpush3.bf16.msra.mxu0 %v1176_v9  ;;  %v633_v9 = vld [vmem:[#allocation2 + $0x2f0] sm:$0xff] }
 0x356   :  { %1178 = vmatprep.subr.bf16.mxu0 %v1284_v0  ;;  %1195 = vmatpush3.bf16.msra.mxu1 %v1194_v56  ;;  %v1212_v13 = vpack.c.bf16 %v634_v10, %v633_v9 }
 0x357   :  { %1196 = vmatprep.subr.bf16.mxu1 %v1284_v0 }
 0x359   :  { %1180 = vmatpush3.bf16.msra.mxu0 %v1179_v14 }
 0x35a   :  { %1181 = vmatprep.subr.bf16.mxu0 %v1284_v0  ;;  %1198 = vmatpush3.bf16.msra.mxu1 %v1197_v59  ;;  %v757_v59 = vld [vmem:[%s1435_s2 + $0xa] sm:$0x3] }
 0x35b   :  { %1199 = vmatprep.subr.bf16.mxu1 %v1284_v0  ;;  %v734_v63 = vrot.slane %v757_v59, %v1355_v12 }
 0x35d   :  { %1183 = vmatpush3.bf16.msra.mxu0 %v1182_v17 }
 0x35e   :  { %1184 = vmatprep.subr.bf16.mxu0 %v1284_v0  ;;  %1201 = vmatpush3.bf16.msra.mxu1 %v1200_v62 }
 0x35f   :  { %1202 = vmatprep.subr.bf16.mxu1 %v1284_v0 }
 0x361   :  { %1186 = vmatpush3.bf16.msra.mxu0 %v1185_v20 }
 0x362   :  { %1187 = vmatprep.subr.bf16.mxu0 %v1284_v0  ;;  %1204 = vmatpush3.bf16.msra.mxu1 %v1203_v3 }
 0x363   :  { %1205 = vmatprep.subr.bf16.mxu1 %v1284_v0 }
 0x365   :  { %1189 = vmatpush3.bf16.msra.mxu0 %v1188_v23 }
 0x366   :  { %1207 = vmatpush3.bf16.msra.mxu1 %v1206_v6 }
 0x367   :  { %1208 = vmatprep.subr.bf16.mxu1 %v1284_v0 }
 0x36a   :  { %1210 = vmatpush3.bf16.msra.mxu1 %v1209_v1 }
 0x36b   :  { %1211 = vmatprep.subr.bf16.mxu1 %v1284_v0 }
 0x36e   :  { %1213 = vmatpush3.bf16.msra.mxu1 %v1212_v13 }
 0x424   :  { %v467_v24 = vpop.f32.mrb[2].mxu1 }
 0x425   :  { %v471_v25 = vrot.slane %v467_v24, 4  ;;  %v999_v27 = vpop.f32.mrb[3].mxu1 }
 0x427   :  { %v472_v28 = vadd.f32 %v471_v25, %v467_v24 }
 0x429   :  { %v473_v29 = vrot.slane %v472_v28, 2 }
 0x42b   :  { %v474_v30 = vadd.f32 %v473_v29, %v472_v28 }
 0x42d   :  { %v475_v31 = vrot.slane %v474_v30, 1 }
 0x42f   :  { %v476_v32 = vadd.f32 %v475_v31, %v474_v30 }
 0x431   :  { %v477_v33 = vmul.f32 0.125, %v476_v32 }
 0x433   :  { %v478_v34 = vsub.f32 %v467_v24, %v477_v33  ;;  %v756_v33 = vld [vmem:[%s1435_s2 + $0x8] sm:$0x3] }
 0x435   :  { %v479_v35 = vmul.f32 %v478_v34, %v478_v34 }
 0x437   :  { %v480_v36 = vrot.slane %v479_v35, 4 }
 0x439   :  { %v481_v37 = vadd.f32 %v480_v36, %v479_v35 }
 0x43b   :  { %v482_v38 = vrot.slane %v481_v37, 2 }
 0x43d   :  { %v483_v39 = vadd.f32 %v482_v38, %v481_v37  ;;  %v616_v37 = vrot.slane %v756_v33, %v1355_v12 }
 0x43f   :  { %v484_v40 = vrot.slane %v483_v39, 1 }
 0x441   :  { %v485_v41 = vadd.f32 %v484_v40, %v483_v39 }
 0x443   :  { %v486_v42 = vmul.f32 0.125, %v485_v41 }
 0x445   :  { %v487_v43 = vadd.f32 1e-05, %v486_v42 }
 0x447   :  { %1227 = vrsqrt.f32 %v487_v43 }
 0x451   :  { %v1228_v45 = vpop.eup %1227 }
 0x452   :  { %v489_v46 = vmul.f32 %v1228_v45, %v755_v44 }
 0x454   :  { %v493_v47 = vrot.slane %v489_v46, %v1353_v11 }
 0x456   :  { %v494_v49 = vmul.f32 %v493_v47, %v478_v34 }
 0x458   :  { %v499_v50 = vadd.f32 %v498_v48, %v494_v49 }
 0x45a   :  { %1033 = vmatmul.mubr.f32.vlgmr.msra.gmra.mrb[4].mxu0 %v499_v50 }
 0x52d   :  { %v585_v14 = vpop.f32.mrb[4].mxu0 }
 0x52e   :  { %v589_v15 = vrot.slane %v585_v14, 4  ;;  %v1034_v16 = vpop.f32.mrb[5].mxu0 }
 0x530   :  { %v590_v17 = vadd.f32 %v589_v15, %v585_v14 }
 0x532   :  { %v591_v18 = vrot.slane %v590_v17, 2 }
 0x534   :  { %v592_v19 = vadd.f32 %v591_v18, %v590_v17 }
 0x536   :  { %v593_v20 = vrot.slane %v592_v19, 1 }
 0x538   :  { %v594_v21 = vadd.f32 %v593_v20, %v592_v19 }
 0x53a   :  { %v595_v22 = vmul.f32 0.125, %v594_v21 }
 0x53c   :  { %v596_v23 = vsub.f32 %v585_v14, %v595_v22 }
 0x53e   :  { %v597_v24 = vmul.f32 %v596_v23, %v596_v23 }
 0x540   :  { %v598_v25 = vrot.slane %v597_v24, 4 }
 0x542   :  { %v599_v27 = vadd.f32 %v598_v25, %v597_v24 }
 0x544   :  { %v600_v28 = vrot.slane %v599_v27, 2 }
 0x546   :  { %v601_v29 = vadd.f32 %v600_v28, %v599_v27 }
 0x548   :  { %v602_v0 = vrot.slane %v601_v29, 1 }
 0x54a   :  { %v603_v30 = vadd.f32 %v602_v0, %v601_v29 }
 0x54c   :  { %v604_v31 = vmul.f32 0.125, %v603_v30 }
 0x54e   :  { %v605_v32 = vadd.f32 1e-05, %v604_v31 }
 0x550   :  { %1229 = vrsqrt.f32 %v605_v32 }
 0x55a   :  { %v1230_v34 = vpop.eup %1229 }
 0x55b   :  { %v607_v35 = vmul.f32 %v1230_v34, %v756_v33 }
 0x55d   :  { %v611_v36 = vrot.slane %v607_v35, %v1353_v11 }
 0x55f   :  { %v612_v38 = vmul.f32 %v611_v36, %v596_v23 }
 0x561   :  { %v617_v39 = vadd.f32 %v616_v37, %v612_v38 }
 0x563   :  { %1068 = vmatmul.mubr.f32.vlgmr.msra.gmra.mrb[4].mxu1 %v617_v39 }
 0x636   :  { %v703_v40 = vpop.f32.mrb[4].mxu1 }
 0x637   :  { %v707_v41 = vrot.slane %v703_v40, 4  ;;  %v1069_v42 = vpop.f32.mrb[5].mxu1 }
 0x639   :  { %v708_v43 = vadd.f32 %v707_v41, %v703_v40 }
 0x63b   :  { %v709_v44 = vrot.slane %v708_v43, 2 }
 0x63d   :  { %v710_v45 = vadd.f32 %v709_v44, %v708_v43 }
 0x63f   :  { %v711_v46 = vrot.slane %v710_v45, 1 }
 0x641   :  { %v712_v47 = vadd.f32 %v711_v46, %v710_v45 }
 0x643   :  { %v713_v48 = vmul.f32 0.125, %v712_v47 }
 0x645   :  { %v714_v49 = vsub.f32 %v703_v40, %v713_v48 }
 0x647   :  { %v715_v50 = vmul.f32 %v714_v49, %v714_v49 }
 0x649   :  { %v716_v51 = vrot.slane %v715_v50, 4 }
 0x64b   :  { %v717_v52 = vadd.f32 %v716_v51, %v715_v50 }
 0x64d   :  { %v718_v53 = vrot.slane %v717_v52, 2 }
 0x64f   :  { %v719_v54 = vadd.f32 %v718_v53, %v717_v52 }
 0x651   :  { %v720_v55 = vrot.slane %v719_v54, 1 }
 0x653   :  { %v721_v56 = vadd.f32 %v720_v55, %v719_v54 }
 0x655   :  { %v722_v57 = vmul.f32 0.125, %v721_v56 }
 0x657   :  { %v723_v58 = vadd.f32 1e-05, %v722_v57 }
 0x659   :  { %1231 = vrsqrt.f32 %v723_v58 }
 0x663   :  { %v1232_v60 = vpop.eup %1231 }
 0x664   :  { %v725_v61 = vmul.f32 %v1232_v60, %v757_v59 }
 0x666   :  { %v729_v62 = vrot.slane %v725_v61, %v1353_v11 }
 0x668   :  { %v730_v2 = vmul.f32 %v729_v62, %v714_v49 }
 0x66a   :  { %v735_v3 = vadd.f32 %v734_v63, %v730_v2 }
 0x66c   :  { %v736_v4 = vadd.f32 %v735_v3, %v1336_v26 }
 0x66e   :  { %737 = vst [vmem:[#allocation5] sm:$0xff] %v736_v4 }
 0x66f   :  { %1266 = shalt.err (!%p1263_p12)
}
 0x670   :  { %s1267_s15 = scalar_lea.hbm %s1436_s3, 128 }
 0x671   :  { %p1268_p13 = scmp.ne.s32.totalorder %s1436_s3, %s1267_s15  ;;  %p1271_p0 = scmp.lt.u32.totalorder %s1267_s15, %s1436_s3 }
 0x673   :  { %p1273_p1 = pnand %p1271_p0, %p1268_p13 }
 0x675   :  { %1276 = shalt.err (!%p1273_p1)
}
 0x676   :  { %747 = dma.vmem_to_hbm [thread:$0]  %s745_s12, 128, %s1436_s3, [#allocation4]  }
 0x677   :  { %1279 = dma.done.wait [#allocation4], 128  }
 0x678   :  { %1280 = vsyncadd [#allocation4], 4294967168 }
 0x679   :  { %751 = vsyncpa [#allocation3], 1 }
 0x67a   :  { %752 = vsyncpa [#allocation4], 1 }

</bundles_post_ra>
